<compile_context>
chip_gen: v7x
topology: tpu7x:2x2x1
jax: 0.10.0
libtpu: 0.0.40
codegen_flags: <defaults>
</compile_context>

<pallas_src>
import jax
import jax.numpy as jnp
import numpy as np
from jax import lax
from jax.experimental import pallas as pl
from jax.experimental.pallas import tpu as pltpu

KH = KW = 3


# ---------------------------------------------------------------------------
# Kernel: one (Cout x Kp) @ (Kp x H*W) MXU matmul per batch element.
# ---------------------------------------------------------------------------
def _conv_matmul_kernel(p_ref, w_ref, o_ref):
    # p_ref: (1, Kp, HW)   im2col patches (transposed), lane axis = HW
    # w_ref: (Cout, Kp)    flattened conv weights
    # o_ref: (1, Cout, HW) conv output, lane axis = HW (lane-dense stores)
    o_ref[0] = jnp.dot(
        w_ref[...], p_ref[0], preferred_element_type=jnp.float32
    ).astype(o_ref.dtype)


# ---------------------------------------------------------------------------
# Wrapper: layout plumbing (zero-pad, im2col pack, weight reshape) + pallas_call
# ---------------------------------------------------------------------------
def model_forward(x, conv_w):
    """x: (N, Cin, H, W) f32; conv_w: (Cout, Cin, 3, 3) f32 -> (N, Cout, H, W)."""
    N, Cin, H, W = x.shape
    Cout = conv_w.shape[0]
    HW = H * W
    K = KH * KW * Cin            # 27
    Kp = 32                      # pad contraction dim to a sublane-friendly size

    # Zero-pad spatially (padding=1) and build transposed im2col patches:
    #   patches[n, tap*Cin + ci, h*W + w] = x_pad[n, ci, h + kh, w + kw]
    # This is pure data replication/layout; the FLOPs stay in the Pallas kernel.
    xp = jnp.pad(x, ((0, 0), (0, 0), (1, 1), (1, 1)))
    taps = [xp[:, :, kh:kh + H, kw:kw + W] for kh in range(KH) for kw in range(KW)]
    patches = jnp.stack(taps, axis=1).reshape(N, K, HW)
    patches = jnp.pad(patches, ((0, 0), (0, Kp - K), (0, 0)))          # (N, 32, HW)

    # Weight matrix with matching (tap, ci) ordering: (Cout, KH, KW, Cin) -> (Cout, K)
    w_mat = jnp.transpose(conv_w, (0, 2, 3, 1)).reshape(Cout, K)
    w_mat = jnp.pad(w_mat, ((0, 0), (0, Kp - K)))                      # (Cout, 32)

    out_flat = pl.pallas_call(
        _conv_matmul_kernel,
        out_shape=jax.ShapeDtypeStruct((N, Cout, HW), jnp.float32),
        grid=(N,),
        in_specs=[
            pl.BlockSpec((1, Kp, HW), lambda n: (n, 0, 0)),
            pl.BlockSpec((Cout, Kp), lambda n: (0, 0)),
        ],
        out_specs=pl.BlockSpec((1, Cout, HW), lambda n: (n, 0, 0)),
        compiler_params=pltpu.CompilerParams(
            dimension_semantics=("parallel",),   # batch shards across TCs on v7x
        ),
    )(patches, w_mat)

    return out_flat.reshape(N, Cout, H, W)


# Pure-JAX reference mirroring the PyTorch forward exactly.
def reference_forward(x, conv_w):
    return lax.conv_general_dilated(
        x, conv_w, window_strides=(1, 1), padding=((1, 1), (1, 1)),
        dimension_numbers=("NCHW", "OIHW", "NCHW"),
        precision=lax.Precision.HIGHEST,
    )


if __name__ == "__main__":
    key = jax.random.PRNGKey(0)
    k1, k2 = jax.random.split(key)
    N, Cin, H, W, Cout = 2, 3, 32, 32, 32
    x = jax.random.normal(k1, (N, Cin, H, W), dtype=jnp.float32)
    conv_w = 0.1 * jax.random.normal(k2, (Cout, Cin, KH, KW), dtype=jnp.float32)

    out = jax.jit(model_forward)(x, conv_w)
    out = jax.block_until_ready(out)

    ref = reference_forward(x, conv_w)
    # Tolerance accounts for MXU bf16-pass rounding of f32 matmul operands.
    np.testing.assert_allclose(np.asarray(out), np.asarray(ref), rtol=1e-2, atol=1e-2)
    assert out.shape == (N, Cout, H, W)
    print("KERNEL_OK")
</pallas_src>

<mosaic_0001>
module attributes {stable_mosaic.version = 11 : i64} {
  func.func @_conv_matmul_kernel(%arg0: i32, %arg1: memref<1x32x1024xf32, #tpu.memory_space<vmem>>, %arg2: memref<32x32xf32, #tpu.memory_space<vmem>>, %arg3: memref<1x32x1024xf32, #tpu.memory_space<vmem>>) attributes {dimension_semantics = [#tpu.dimension_semantics<parallel>], iteration_bounds = array<i64: 2>, scalar_prefetch = 0 : i64, scratch_operands = 0 : i64, tpu.core_type = #tpu.core_type<tc>, window_params = [{transform_indices = @transform_0, window_bounds = array<i64: 1, 32, 1024>}, {pipeline_mode = #tpu.pipeline_mode<synchronous>, transform_indices = @transform_1, window_bounds = array<i64: 32, 32>}, {transform_indices = @transform_2, window_bounds = array<i64: 1, 32, 1024>}]} {
    %c0 = arith.constant 0 : index
    %c0_0 = arith.constant 0 : index
    %0 = vector.load %arg2[%c0, %c0_0] : memref<32x32xf32, #tpu.memory_space<vmem>>, vector<32x32xf32>
    %c0_1 = arith.constant 0 : index
    %c0_2 = arith.constant 0 : index
    %c0_3 = arith.constant 0 : index
    %1 = vector.load %arg1[%c0_1, %c0_2, %c0_3] : memref<1x32x1024xf32, #tpu.memory_space<vmem>>, vector<1x32x1024xf32>
    %2 = vector.shape_cast %1 : vector<1x32x1024xf32> to vector<32x1024xf32>
    %cst = arith.constant dense<0.000000e+00> : vector<32x1024xf32>
    %3 = tpu.matmul %0, %2, %cst {dimension_numbers = #tpu.dot_dimension_numbers<[1], [0], [0], [1], [0, 0, 1, 1], [], []>} : vector<32x32xf32>, vector<32x1024xf32>, vector<32x1024xf32> -> vector<32x1024xf32>
    %c0_4 = arith.constant 0 : index
    %c0_5 = arith.constant 0 : index
    %c0_6 = arith.constant 0 : index
    %4 = vector.load %arg3[%c0_4, %c0_5, %c0_6] : memref<1x32x1024xf32, #tpu.memory_space<vmem>>, vector<1x32x1024xf32>
    %5 = vector.shape_cast %4 : vector<1x32x1024xf32> to vector<32x1024xf32>
    %6 = vector.shape_cast %3 : vector<32x1024xf32> to vector<1x32x1024xf32>
    tpu.vector_store %arg3[%c0_4, %c0_5, %c0_6], %6 {strides = array<i32>} : memref<1x32x1024xf32, #tpu.memory_space<vmem>>, vector<1x32x1024xf32>,
    return
  }
  func.func @transform_0(%arg0: i32) -> (i32, i32, i32) {
    %c0_i32 = arith.constant 0 : i32
    %c0_i32_0 = arith.constant 0 : i32
    %c0_i32_1 = arith.constant 0 : i32
    return %arg0, %c0_i32, %c0_i32_0 : i32, i32, i32
  }
  func.func @transform_1(%arg0: i32) -> (i32, i32) {
    %c0_i32 = arith.constant 0 : i32
    %c0_i32_0 = arith.constant 0 : i32
    %c0_i32_1 = arith.constant 0 : i32
    return %c0_i32, %c0_i32_0 : i32, i32
  }
  func.func @transform_2(%arg0: i32) -> (i32, i32, i32) {
    %c0_i32 = arith.constant 0 : i32
    %c0_i32_0 = arith.constant 0 : i32
    %c0_i32_1 = arith.constant 0 : i32
    return %arg0, %c0_i32, %c0_i32_0 : i32, i32, i32
  }
}

</mosaic_0001>

<bundles_post_ra>
// kernel: model_forward.1
= control target key start
LH: loop header
LB: loop body
LE: loop exit
PB: predicated region body
PF: predicated region fallthrough
CT: control target
= control target key end

     0   :  { %s730_s9 = smov 0   ;;  %s866_s0 = inlined_call_operand.vmem [shape: f32[2,32,1024], index: 0, kind: input, shape index: {}]   ;;  %s867_s1 = inlined_call_operand.vmem [shape: f32[32,32], index: 1, kind: input, shape index: {}]   ;;  %s868_s2 = inlined_call_operand.vmem [shape: f32[2,32,1024], index: 2, kind: output, shape index: {}]  }
   0x1 LB: > { %s636_s10 = sadd.s32 4294967295, %s712_s9   ;;  %p640_p0 = scmp.ge.s32.totalorder %s712_s9, 1  ;;  %s712_s9 = sphi %s730_s9, %s12_s9  }
   0x2   : > { %p112_p1 = scmp.lt.s32.totalorder %s712_s9, 3 }
   0x4   : > { %p113_p2 = pnand %p640_p0, %p112_p1 }
   0x5   : > { %p134_p3 = scmp.lt.s32.totalorder (!%p113_p2), %s636_s10, 1  ;;  %v714_v0 = vmov (!%p113_p2), 0.0   ;;  %v144_v27 = vld [vmem:[%s867_s1] sm:$0xff] (!%p113_p2)  ;;  %vm180_vm0 = vcmask (!%p113_p2), 261120   ;;  %v145_v48 = vld [vmem:[%s867_s1 + $0x8] sm:$0xff] (!%p113_p2)  ;;  %v146_v51 = vld [vmem:[%s867_s1 + $0x10] sm:$0xff] (!%p113_p2) }
   0x6   : > { %116 = sbr.rel (%p113_p2) target bundleno = 271 (0x10f), region = 28  ;;  %257 = vmatprep.mubr.f32.mxu0 (!%p113_p2), %v714_v0  ;;  %346 = vmatprep.mubr.f32.mxu1 (!%p113_p2), %v714_v0  ;;  %v147_v52 = vld [vmem:[%s867_s1 + $0x18] sm:$0xff] (!%p113_p2) }
   0xd   : > { %s870_s10 = smov (!%p134_p3, %s636_s10), 1 }
   0xe   : > { %s663_s11 = sshll.u32 %s870_s10, 8 }
   0xf   : > { %s748_s14 = scalar_lea.vmem %s866_s0, %s663_s11  ;;  %s829_s25 = scalar_lea.vmem %s868_s2, %s663_s11 }
  0x10   : > { %v149_v1 = vld [vmem:[%s748_s14 + $0x8] sm:$0xff]  ;;  %v151_v3 = vld [vmem:[%s748_s14 + $0x18] sm:$0xff]  ;;  %v148_v6 = vld [vmem:[%s748_s14] sm:$0xff] }
  0x11   : > { %v157_v2 = vld [vmem:[%s748_s14 + $0x48] sm:$0xff]  ;;  %v159_v5 = vld [vmem:[%s748_s14 + $0x58] sm:$0xff]  ;;  %v156_v7 = vld [vmem:[%s748_s14 + $0x40] sm:$0xff] }
  0x12   : > { %v665_v4 = vpack.c.bf16 %v157_v2, %v149_v1  ;;  %v673_v8 = vpack.c.bf16 %v159_v5, %v151_v3  ;;  %v667_v9 = vpack.c.bf16 %v156_v7, %v148_v6  ;;  %v150_v10 = vld [vmem:[%s748_s14 + $0x10] sm:$0xff]  ;;  %v165_v12 = vld [vmem:[%s748_s14 + $0x88] sm:$0xff]  ;;  %v167_v15 = vld [vmem:[%s748_s14 + $0x98] sm:$0xff] }
  0x13   : > { %v158_v11 = vld [vmem:[%s748_s14 + $0x50] sm:$0xff]  ;;  %v173_v14 = vld [vmem:[%s748_s14 + $0xc8] sm:$0xff]  ;;  %v175_v16 = vld [vmem:[%s748_s14 + $0xd8] sm:$0xff] }
  0x14   : > { %666 = vmatprep.subr.bf16.mxu0 %v665_v4  ;;  %v675_v13 = vpack.c.bf16 %v158_v11, %v150_v10  ;;  %674 = vmatprep.subr.bf16.mxu1 %v673_v8  ;;  %v669_v17 = vpack.c.bf16 %v173_v14, %v165_v12  ;;  %v677_v18 = vpack.c.bf16 %v175_v16, %v167_v15  ;;  %v164_v19 = vld [vmem:[%s748_s14 + $0x80] sm:$0xff]  ;;  %v166_v21 = vld [vmem:[%s748_s14 + $0x90] sm:$0xff]  ;;  %v153_v24 = vld [vmem:[%s748_s14 + $0x28] sm:$0xff] }
  0x15   : > { %668 = vmatpush1.bf16.msra.mxu0 %v667_v9  ;;  %v172_v20 = vld [vmem:[%s748_s14 + $0xc0] sm:$0xff]  ;;  %v174_v23 = vld [vmem:[%s748_s14 + $0xd0] sm:$0xff]  ;;  %v161_v25 = vld [vmem:[%s748_s14 + $0x68] sm:$0xff] }
  0x16   : > { %676 = vmatpush1.bf16.msra.mxu1 %v675_v13  ;;  %v671_v22 = vpack.c.bf16 %v172_v20, %v164_v19  ;;  %670 = vmatprep.subr.bf16.mxu0 %v669_v17  ;;  %v679_v26 = vpack.c.bf16 %v174_v23, %v166_v21  ;;  %v681_v28 = vpack.c.bf16 %v161_v25, %v153_v24  ;;  %v155_v29 = vld [vmem:[%s748_s14 + $0x38] sm:$0xff]  ;;  %v152_v31 = vld [vmem:[%s748_s14 + $0x20] sm:$0xff]  ;;  %v154_v34 = vld [vmem:[%s748_s14 + $0x30] sm:$0xff] }
  0x17   : > { %678 = vmatprep.subr.bf16.mxu1 %v677_v18  ;;  %v163_v30 = vld [vmem:[%s748_s14 + $0x78] sm:$0xff]  ;;  %v160_v33 = vld [vmem:[%s748_s14 + $0x60] sm:$0xff]  ;;  %v162_v35 = vld [vmem:[%s748_s14 + $0x70] sm:$0xff] }
  0x18   : > { %v689_v32 = vpack.c.bf16 %v163_v30, %v155_v29  ;;  %v683_v36 = vpack.c.bf16 %v160_v33, %v152_v31  ;;  %v169_v37 = vld [vmem:[%s748_s14 + $0xa8] sm:$0xff]  ;;  %v171_v39 = vld [vmem:[%s748_s14 + $0xb8] sm:$0xff]  ;;  %v691_v40 = vpack.c.bf16 %v162_v35, %v154_v34  ;;  %v168_v43 = vld [vmem:[%s748_s14 + $0xa0] sm:$0xff] }
  0x19   : > { %672 = vmatpush1.bf16.msra.mxu0 %v671_v22  ;;  %v177_v38 = vld [vmem:[%s748_s14 + $0xe8] sm:$0xff]  ;;  %v179_v41 = vld [vmem:[%s748_s14 + $0xf8] sm:$0xff]  ;;  %v176_v44 = vld [vmem:[%s748_s14 + $0xe0] sm:$0xff] }
  0x1a   : > { %680 = vmatpush1.bf16.msra.mxu1 %v679_v26  ;;  %682 = vmatprep.subr.bf16.mxu0 %v681_v28  ;;  %v685_v42 = vpack.c.bf16 %v177_v38, %v169_v37  ;;  %v693_v45 = vpack.c.bf16 %v179_v41, %v171_v39  ;;  %v170_v46 = vld [vmem:[%s748_s14 + $0xb0] sm:$0xff]  ;;  %v687_v49 = vpack.c.bf16 %v176_v44, %v168_v43 }
  0x1b   : > { %690 = vmatprep.subr.bf16.mxu1 %v689_v32  ;;  %v178_v47 = vld [vmem:[%s748_s14 + $0xf0] sm:$0xff] }
  0x1c   : > { %645 = vmatmul.mubr.msk.f32.vlgmr.msra.gmra.mrb[0].mxu0 %vm180_vm0, %v144_v27  ;;  %v695_v50 = vpack.c.bf16 %v178_v47, %v170_v46 }
  0x1d   : > { %649 = vmatmul.mubr.msk.f32.vlgmr.msra.gmra.mrb[0].mxu1 %vm180_vm0, %v144_v27  ;;  %684 = vmatpush1.bf16.msra.mxu0 %v683_v36 }
  0x1e   : > { %692 = vmatpush1.bf16.msra.mxu1 %v691_v40  ;;  %263 = vmatprep.mubr.f32.mxu0 %v714_v0 }
  0x1f   : > { %352 = vmatprep.mubr.f32.mxu1 %v714_v0  ;;  %686 = vmatprep.subr.bf16.mxu0 %v685_v42 }
  0x20   : > { %646 = vmatmul.mubr.msk.f32.gmra.mrb[2].mxu0 %vm180_vm0, %v145_v48  ;;  %694 = vmatprep.subr.bf16.mxu1 %v693_v45 }
  0x21   : > { %650 = vmatmul.mubr.msk.f32.gmra.mrb[2].mxu1 %vm180_vm0, %v145_v48  ;;  %269 = vmatprep.mubr.f32.mxu0 %v714_v0 }
  0x22   : > { %358 = vmatprep.mubr.f32.mxu1 %v714_v0  ;;  %688 = vmatpush1.bf16.msra.mxu0 %v687_v49 }
  0x23   : > { %696 = vmatpush1.bf16.msra.mxu1 %v695_v50 }
  0x24   : > { %647 = vmatmul.mubr.msk.f32.gmra.mrb[4].mxu0 %vm180_vm0, %v146_v51 }
  0x25   : > { %651 = vmatmul.mubr.msk.f32.gmra.mrb[4].mxu1 %vm180_vm0, %v146_v51  ;;  %275 = vmatprep.mubr.f32.mxu0 %v714_v0 }
  0x26   : > { %364 = vmatprep.mubr.f32.mxu1 %v714_v0 }
  0x28   : > { %648 = vmatmul.mubr.msk.f32.gmra.mrb[6].mxu0 %vm180_vm0, %v147_v52 }
  0x29   : > { %652 = vmatmul.mubr.msk.f32.gmra.mrb[6].mxu1 %vm180_vm0, %v147_v52  ;;  %435 = vmatprep.mubr.f32.mxu0 %v714_v0 }
  0x2a   : > { %524 = vmatprep.mubr.f32.mxu1 %v714_v0 }
  0x2c   : > { %653 = vmatmul.mubr.msk.f32.vlgmr.msra.gmra.mrb[8].mxu0 %vm180_vm0, %v144_v27 }
  0x2d   : > { %657 = vmatmul.mubr.msk.f32.vlgmr.msra.gmra.mrb[8].mxu1 %vm180_vm0, %v144_v27  ;;  %441 = vmatprep.mubr.f32.mxu0 %v714_v0 }
  0x2e   : > { %530 = vmatprep.mubr.f32.mxu1 %v714_v0 }
  0x30   : > { %654 = vmatmul.mubr.msk.f32.gmra.mrb[10].mxu0 %vm180_vm0, %v145_v48 }
  0x31   : > { %658 = vmatmul.mubr.msk.f32.gmra.mrb[10].mxu1 %vm180_vm0, %v145_v48  ;;  %447 = vmatprep.mubr.f32.mxu0 %v714_v0 }
  0x32   : > { %536 = vmatprep.mubr.f32.mxu1 %v714_v0 }
  0x34   : > { %655 = vmatmul.mubr.msk.f32.gmra.mrb[12].mxu0 %vm180_vm0, %v146_v51 }
  0x35   : > { %659 = vmatmul.mubr.msk.f32.gmra.mrb[12].mxu1 %vm180_vm0, %v146_v51  ;;  %453 = vmatprep.mubr.f32.mxu0 %v714_v0 }
  0x36   : > { %542 = vmatprep.mubr.f32.mxu1 %v714_v0 }
  0x38   : > { %656 = vmatmul.mubr.msk.f32.gmra.mrb[14].mxu0 %vm180_vm0, %v147_v52 }
  0x39   : > { %660 = vmatmul.mubr.msk.f32.gmra.mrb[14].mxu1 %vm180_vm0, %v147_v52 }
  0xef   : > { %v259_v53 = vpop.f32.mrb[0].mxu0 }
  0xf0   : > { %549 = vst [vmem:[%s829_s25] sm:$0xff] %v259_v53  ;;  %v348_v54 = vpop.f32.mrb[0].mxu1  ;;  %v261_v55 = vpop.f32.mrb[1].mxu0 }
  0xf1   : > { %551 = vst [vmem:[%s829_s25 + $0x10] sm:$0xff] %v348_v54  ;;  %550 = vst [vmem:[%s829_s25 + $0x8] sm:$0xff] %v261_v55  ;;  %v350_v56 = vpop.f32.mrb[1].mxu1 }
  0xf2   : > { %552 = vst [vmem:[%s829_s25 + $0x18] sm:$0xff] %v350_v56 }
  0xf3   : > { %v265_v57 = vpop.f32.mrb[2].mxu0 }
  0xf4   : > { %557 = vst [vmem:[%s829_s25 + $0x40] sm:$0xff] %v265_v57  ;;  %v354_v58 = vpop.f32.mrb[2].mxu1  ;;  %v267_v59 = vpop.f32.mrb[3].mxu0 }
  0xf5   : > { %559 = vst [vmem:[%s829_s25 + $0x50] sm:$0xff] %v354_v58  ;;  %558 = vst [vmem:[%s829_s25 + $0x48] sm:$0xff] %v267_v59  ;;  %v356_v60 = vpop.f32.mrb[3].mxu1 }
  0xf6   : > { %560 = vst [vmem:[%s829_s25 + $0x58] sm:$0xff] %v356_v60 }
  0xf7   : > { %v271_v61 = vpop.f32.mrb[4].mxu0 }
  0xf8   : > { %565 = vst [vmem:[%s829_s25 + $0x80] sm:$0xff] %v271_v61  ;;  %v360_v62 = vpop.f32.mrb[4].mxu1  ;;  %v273_v63 = vpop.f32.mrb[5].mxu0 }
  0xf9   : > { %567 = vst [vmem:[%s829_s25 + $0x90] sm:$0xff] %v360_v62  ;;  %566 = vst [vmem:[%s829_s25 + $0x88] sm:$0xff] %v273_v63  ;;  %v362_v0 = vpop.f32.mrb[5].mxu1 }
  0xfa   : > { %568 = vst [vmem:[%s829_s25 + $0x98] sm:$0xff] %v362_v0 }
  0xfb   : > { %v277_v1 = vpop.f32.mrb[6].mxu0 }
  0xfc   : > { %573 = vst [vmem:[%s829_s25 + $0xc0] sm:$0xff] %v277_v1  ;;  %v366_v2 = vpop.f32.mrb[6].mxu1  ;;  %v279_v3 = vpop.f32.mrb[7].mxu0 }
  0xfd   : > { %575 = vst [vmem:[%s829_s25 + $0xd0] sm:$0xff] %v366_v2  ;;  %574 = vst [vmem:[%s829_s25 + $0xc8] sm:$0xff] %v279_v3  ;;  %v368_v4 = vpop.f32.mrb[7].mxu1 }
  0xfe   : > { %576 = vst [vmem:[%s829_s25 + $0xd8] sm:$0xff] %v368_v4 }
  0xff   : > { %v437_v5 = vpop.f32.mrb[8].mxu0 }
 0x100   : > { %553 = vst [vmem:[%s829_s25 + $0x20] sm:$0xff] %v437_v5  ;;  %v526_v6 = vpop.f32.mrb[8].mxu1  ;;  %v439_v7 = vpop.f32.mrb[9].mxu0 }
 0x101   : > { %555 = vst [vmem:[%s829_s25 + $0x30] sm:$0xff] %v526_v6  ;;  %554 = vst [vmem:[%s829_s25 + $0x28] sm:$0xff] %v439_v7  ;;  %v528_v8 = vpop.f32.mrb[9].mxu1 }
 0x102   : > { %556 = vst [vmem:[%s829_s25 + $0x38] sm:$0xff] %v528_v8 }
 0x103   : > { %v443_v9 = vpop.f32.mrb[10].mxu0 }
 0x104   : > { %561 = vst [vmem:[%s829_s25 + $0x60] sm:$0xff] %v443_v9  ;;  %v532_v10 = vpop.f32.mrb[10].mxu1  ;;  %v445_v11 = vpop.f32.mrb[11].mxu0 }
 0x105   : > { %563 = vst [vmem:[%s829_s25 + $0x70] sm:$0xff] %v532_v10  ;;  %562 = vst [vmem:[%s829_s25 + $0x68] sm:$0xff] %v445_v11  ;;  %v534_v12 = vpop.f32.mrb[11].mxu1 }
 0x106   : > { %564 = vst [vmem:[%s829_s25 + $0x78] sm:$0xff] %v534_v12 }
 0x107   : > { %v449_v13 = vpop.f32.mrb[12].mxu0 }
 0x108   : > { %569 = vst [vmem:[%s829_s25 + $0xa0] sm:$0xff] %v449_v13  ;;  %v538_v14 = vpop.f32.mrb[12].mxu1  ;;  %v451_v15 = vpop.f32.mrb[13].mxu0 }
 0x109   : > { %571 = vst [vmem:[%s829_s25 + $0xb0] sm:$0xff] %v538_v14  ;;  %570 = vst [vmem:[%s829_s25 + $0xa8] sm:$0xff] %v451_v15  ;;  %v540_v16 = vpop.f32.mrb[13].mxu1 }
 0x10a   : > { %572 = vst [vmem:[%s829_s25 + $0xb8] sm:$0xff] %v540_v16 }
 0x10b   : > { %v455_v17 = vpop.f32.mrb[14].mxu0 }
 0x10c   : > { %577 = vst [vmem:[%s829_s25 + $0xe0] sm:$0xff] %v455_v17  ;;  %v544_v18 = vpop.f32.mrb[14].mxu1  ;;  %v457_v19 = vpop.f32.mrb[15].mxu0 }
 0x10d   : > { %579 = vst [vmem:[%s829_s25 + $0xf0] sm:$0xff] %v544_v18  ;;  %578 = vst [vmem:[%s829_s25 + $0xe8] sm:$0xff] %v457_v19  ;;  %v546_v20 = vpop.f32.mrb[15].mxu1 }
 0x10e   : > { %580 = vst [vmem:[%s829_s25 + $0xf8] sm:$0xff] %v546_v20 }
 0x10f PF: > { %s12_s9 = sadd.s32 1, %s712_s9  }
 0x110   : > { %p9_p4 = scmp.ge.s32.totalorder %s12_s9, 4  }
 0x112   :  { %11 = sbr.rel (!%p9_p4) target bundleno = 1 (0x1), region = 58 }

</bundles_post_ra>
